<compile_context>
chip_gen: v7x
topology: tpu7x:2x2x1
jax: 0.10.0
libtpu: 0.0.40
codegen_flags: <defaults>
</compile_context>

<pallas_src>
import jax
import jax.numpy as jnp
from jax.experimental import pallas as pl
from jax.experimental.pallas import tpu as pltpu


D_IN, D_H1, D_H2, D_OUT = 28 * 28, 200, 50, 10
# Lane-padded layer widths (multiples of 128).
P_H1, P_H2, P_OUT = 256, 128, 128

TILE_B_MAX = 512  # 512-1024 hits ~85% of HBM roofline; 512 keeps v7x VMEM safe.


def _round_up(n: int, m: int) -> int:
    return (n + m - 1) // m * m


def _mlp_kernel(x_ref, w1_ref, b1_ref, w2_ref, b2_ref, w3_ref, b3_ref, o_ref):
    # fc1 + ReLU  (bf16 operands, f32 accumulate, f32 epilogue)
    x = x_ref[...].astype(jnp.bfloat16)
    h1 = jnp.dot(x, w1_ref[...], preferred_element_type=jnp.float32)
    h1 = jnp.maximum(h1 + b1_ref[...], 0.0)
    # fc2 + ReLU
    h2 = jnp.dot(h1.astype(jnp.bfloat16), w2_ref[...],
                 preferred_element_type=jnp.float32)
    h2 = jnp.maximum(h2 + b2_ref[...], 0.0)
    # fc3 (no activation); padded output lanes are exactly zero.
    out = jnp.dot(h2.astype(jnp.bfloat16), w3_ref[...],
                  preferred_element_type=jnp.float32)
    o_ref[...] = (out + b3_ref[...]).astype(o_ref.dtype)


def neural_net_forward(x, padded_params):
    """x: [B, 1, 28, 28] or [B, 784]. padded_params from prepare_params().
    Returns logits [B, 10] (float32)."""
    w1, b1, w2, b2, w3, b3 = padded_params
    x2d = x.reshape(-1, D_IN).astype(jnp.float32)
    B = x2d.shape[0]

    # Pick a batch tile: up to TILE_B_MAX, always a multiple of 16.
    tile_b = min(TILE_B_MAX, _round_up(max(B, 1), 16))
    b_pad = _round_up(B, tile_b)
    if b_pad != B:
        x2d = jnp.pad(x2d, ((0, b_pad - B), (0, 0)))
    grid = (pl.cdiv(b_pad, tile_b),)

    out = pl.pallas_call(
        _mlp_kernel,
        out_shape=jax.ShapeDtypeStruct((b_pad, P_OUT), jnp.float32),
        grid=grid,
        in_specs=[
            # Activations: tiled along batch, double-buffered by the pipeline.
            pl.BlockSpec((tile_b, D_IN), lambda i: (i, 0)),
            # Weights / biases: constant block index -> resident, DMA'd once.
            # TODO(synk): could request pipeline_mode=pl.Buffered(1) here to
            # drop the second (unused) weight buffer and save ~0.7 MiB VMEM.
            pl.BlockSpec((D_IN, P_H1), lambda i: (0, 0)),
            pl.BlockSpec((1, P_H1), lambda i: (0, 0)),
            pl.BlockSpec((P_H1, P_H2), lambda i: (0, 0)),
            pl.BlockSpec((1, P_H2), lambda i: (0, 0)),
            pl.BlockSpec((P_H2, P_OUT), lambda i: (0, 0)),
            pl.BlockSpec((1, P_OUT), lambda i: (0, 0)),
        ],
        out_specs=pl.BlockSpec((tile_b, P_OUT), lambda i: (i, 0)),
        compiler_params=pltpu.CompilerParams(
            dimension_semantics=("parallel",),      # megacore on v7x
            vmem_limit_bytes=32 * 1024 * 1024,
        ),
    )(x2d, w1, b1, w2, b2, w3, b3)

    return out[:B, :D_OUT]


def init_params(key):
    """Logical (unpadded, f32) parameters matching PyTorch nn.Linear default
    init: U(-1/sqrt(fan_in), 1/sqrt(fan_in)) for weight and bias.
    Weights stored as [in, out] so the kernel computes x @ W."""
    def linear(k, fan_in, fan_out):
        kw, kb = jax.random.split(k)
        bound = 1.0 / jnp.sqrt(float(fan_in))
        w = jax.random.uniform(kw, (fan_in, fan_out), jnp.float32, -bound, bound)
        b = jax.random.uniform(kb, (1, fan_out), jnp.float32, -bound, bound)
        return w, b

    k1, k2, k3 = jax.random.split(key, 3)
    w1, b1 = linear(k1, D_IN, D_H1)
    w2, b2 = linear(k2, D_H1, D_H2)
    w3, b3 = linear(k3, D_H2, D_OUT)
    return (w1, b1, w2, b2, w3, b3)


def prepare_params(params):
    """Zero-pad to lane-dense shapes and cast weights to bf16 (one-time cost).
    Biases stay f32 (epilogue is f32)."""
    w1, b1, w2, b2, w3, b3 = params

    def pad2(a, rows, cols):
        return jnp.pad(a, ((0, rows - a.shape[0]), (0, cols - a.shape[1])))

    w1p = pad2(w1, D_IN, P_H1).astype(jnp.bfloat16)
    b1p = pad2(b1, 1, P_H1).astype(jnp.float32)
    w2p = pad2(w2, P_H1, P_H2).astype(jnp.bfloat16)
    b2p = pad2(b2, 1, P_H2).astype(jnp.float32)
    w3p = pad2(w3, P_H2, P_OUT).astype(jnp.bfloat16)
    b3p = pad2(b3, 1, P_OUT).astype(jnp.float32)
    return (w1p, b1p, w2p, b2p, w3p, b3p)


def _reference_forward(x, params):
    """Pure-JAX f32 reference of the PyTorch forward."""
    w1, b1, w2, b2, w3, b3 = params
    x2d = x.reshape(-1, D_IN).astype(jnp.float32)
    h1 = jnp.maximum(x2d @ w1 + b1, 0.0)
    h2 = jnp.maximum(h1 @ w2 + b2, 0.0)
    return h2 @ w3 + b3


if __name__ == "__main__":
    key = jax.random.PRNGKey(0)
    k_params, k_x = jax.random.split(key)

    params = init_params(k_params)
    padded = prepare_params(params)

    # Small MNIST-like batch: NCHW [2, 1, 28, 28]
    x = jax.random.normal(k_x, (2, 1, 28, 28), dtype=jnp.float32)

    out = neural_net_forward(x, padded)
    out = jax.block_until_ready(out)

    ref = _reference_forward(x, params)
    assert out.shape == (2, D_OUT)
    # bf16 matmul operands with f32 accumulation -> loose-ish tolerance vs f32 ref.
    assert jnp.allclose(out, ref, atol=5e-2, rtol=5e-2), (
        f"max abs err {jnp.max(jnp.abs(out - ref))}")

    print("KERNEL_OK")
</pallas_src>

<mosaic_0001>
module attributes {stable_mosaic.version = 11 : i64} {
  func.func @_mlp_kernel(%arg0: i32, %arg1: memref<16x784xf32, #tpu.memory_space<vmem>>, %arg2: memref<784x256xbf16, #tpu.memory_space<vmem>>, %arg3: memref<1x256xf32, #tpu.memory_space<vmem>>, %arg4: memref<256x128xbf16, #tpu.memory_space<vmem>>, %arg5: memref<1x128xf32, #tpu.memory_space<vmem>>, %arg6: memref<128x128xbf16, #tpu.memory_space<vmem>>, %arg7: memref<1x128xf32, #tpu.memory_space<vmem>>, %arg8: memref<16x128xf32, #tpu.memory_space<vmem>>) attributes {dimension_semantics = [#tpu.dimension_semantics<parallel>], iteration_bounds = array<i64: 1>, scalar_prefetch = 0 : i64, scratch_operands = 0 : i64, tpu.core_type = #tpu.core_type<tc>, window_params = [{transform_indices = @transform_0, window_bounds = array<i64: 16, 784>}, {pipeline_mode = #tpu.pipeline_mode<synchronous>, transform_indices = @transform_1, window_bounds = array<i64: 784, 256>}, {pipeline_mode = #tpu.pipeline_mode<synchronous>, transform_indices = @transform_2, window_bounds = array<i64: 1, 256>}, {pipeline_mode = #tpu.pipeline_mode<synchronous>, transform_indices = @transform_3, window_bounds = array<i64: 256, 128>}, {pipeline_mode = #tpu.pipeline_mode<synchronous>, transform_indices = @transform_4, window_bounds = array<i64: 1, 128>}, {pipeline_mode = #tpu.pipeline_mode<synchronous>, transform_indices = @transform_5, window_bounds = array<i64: 128, 128>}, {pipeline_mode = #tpu.pipeline_mode<synchronous>, transform_indices = @transform_6, window_bounds = array<i64: 1, 128>}, {transform_indices = @transform_7, window_bounds = array<i64: 16, 128>}]} {
    %c0 = arith.constant 0 : index
    %c0_0 = arith.constant 0 : index
    %0 = vector.load %arg1[%c0, %c0_0] : memref<16x784xf32, #tpu.memory_space<vmem>>, vector<16x784xf32>
    %1 = arith.truncf %0 : vector<16x784xf32> to vector<16x784xbf16>
    %c0_1 = arith.constant 0 : index
    %c0_2 = arith.constant 0 : index
    %2 = vector.load %arg2[%c0_1, %c0_2] : memref<784x256xbf16, #tpu.memory_space<vmem>>, vector<784x256xbf16>
    %cst = arith.constant dense<0.000000e+00> : vector<16x256xf32>
    %3 = tpu.matmul %1, %2, %cst {dimension_numbers = #tpu.dot_dimension_numbers<[1], [0], [0], [1], [0, 0, 1, 1], [], []>} : vector<16x784xbf16>, vector<784x256xbf16>, vector<16x256xf32> -> vector<16x256xf32>
    %c0_3 = arith.constant 0 : index
    %c0_4 = arith.constant 0 : index
    %4 = vector.load %arg3[%c0_3, %c0_4] : memref<1x256xf32, #tpu.memory_space<vmem>>, vector<1x256xf32>
    %5 = vector.broadcast %4 : vector<1x256xf32> to vector<16x256xf32>
    %6 = arith.addf %3, %5 : vector<16x256xf32>
    %cst_5 = arith.constant 0.000000e+00 : f32
    %7 = vector.broadcast %cst_5 : f32 to vector<16x256xf32>
    %8 = arith.maximumf %6, %7 : vector<16x256xf32>
    %9 = arith.truncf %8 : vector<16x256xf32> to vector<16x256xbf16>
    %c0_6 = arith.constant 0 : index
    %c0_7 = arith.constant 0 : index
    %10 = vector.load %arg4[%c0_6, %c0_7] : memref<256x128xbf16, #tpu.memory_space<vmem>>, vector<256x128xbf16>
    %cst_8 = arith.constant dense<0.000000e+00> : vector<16x128xf32>
    %11 = tpu.matmul %9, %10, %cst_8 {dimension_numbers = #tpu.dot_dimension_numbers<[1], [0], [0], [1], [0, 0, 1, 1], [], []>} : vector<16x256xbf16>, vector<256x128xbf16>, vector<16x128xf32> -> vector<16x128xf32>
    %c0_9 = arith.constant 0 : index
    %c0_10 = arith.constant 0 : index
    %12 = vector.load %arg5[%c0_9, %c0_10] : memref<1x128xf32, #tpu.memory_space<vmem>>, vector<1x128xf32>
    %13 = vector.broadcast %12 : vector<1x128xf32> to vector<16x128xf32>
    %14 = arith.addf %11, %13 : vector<16x128xf32>
    %cst_11 = arith.constant 0.000000e+00 : f32
    %15 = vector.broadcast %cst_11 : f32 to vector<16x128xf32>
    %16 = arith.maximumf %14, %15 : vector<16x128xf32>
    %17 = arith.truncf %16 : vector<16x128xf32> to vector<16x128xbf16>
    %c0_12 = arith.constant 0 : index
    %c0_13 = arith.constant 0 : index
    %18 = vector.load %arg6[%c0_12, %c0_13] : memref<128x128xbf16, #tpu.memory_space<vmem>>, vector<128x128xbf16>
    %cst_14 = arith.constant dense<0.000000e+00> : vector<16x128xf32>
    %19 = tpu.matmul %17, %18, %cst_14 {dimension_numbers = #tpu.dot_dimension_numbers<[1], [0], [0], [1], [0, 0, 1, 1], [], []>} : vector<16x128xbf16>, vector<128x128xbf16>, vector<16x128xf32> -> vector<16x128xf32>
    %c0_15 = arith.constant 0 : index
    %c0_16 = arith.constant 0 : index
    %20 = vector.load %arg7[%c0_15, %c0_16] : memref<1x128xf32, #tpu.memory_space<vmem>>, vector<1x128xf32>
    %21 = vector.broadcast %20 : vector<1x128xf32> to vector<16x128xf32>
    %22 = arith.addf %19, %21 : vector<16x128xf32>
    %c0_17 = arith.constant 0 : index
    %c0_18 = arith.constant 0 : index
    %23 = vector.load %arg8[%c0_17, %c0_18] : memref<16x128xf32, #tpu.memory_space<vmem>>, vector<16x128xf32>
    tpu.vector_store %arg8[%c0_17, %c0_18], %22 {strides = array<i32>} : memref<16x128xf32, #tpu.memory_space<vmem>>, vector<16x128xf32>,
    return
  }
  func.func @transform_0(%arg0: i32) -> (i32, i32) {
    %c0_i32 = arith.constant 0 : i32
    %c0_i32_0 = arith.constant 0 : i32
    return %arg0, %c0_i32 : i32, i32
  }
  func.func @transform_1(%arg0: i32) -> (i32, i32) {
    %c0_i32 = arith.constant 0 : i32
    %c0_i32_0 = arith.constant 0 : i32
    %c0_i32_1 = arith.constant 0 : i32
    return %c0_i32, %c0_i32_0 : i32, i32
  }
  func.func @transform_2(%arg0: i32) -> (i32, i32) {
    %c0_i32 = arith.constant 0 : i32
    %c0_i32_0 = arith.constant 0 : i32
    %c0_i32_1 = arith.constant 0 : i32
    return %c0_i32, %c0_i32_0 : i32, i32
  }
  func.func @transform_3(%arg0: i32) -> (i32, i32) {
    %c0_i32 = arith.constant 0 : i32
    %c0_i32_0 = arith.constant 0 : i32
    %c0_i32_1 = arith.constant 0 : i32
    return %c0_i32, %c0_i32_0 : i32, i32
  }
  func.func @transform_4(%arg0: i32) -> (i32, i32) {
    %c0_i32 = arith.constant 0 : i32
    %c0_i32_0 = arith.constant 0 : i32
    %c0_i32_1 = arith.constant 0 : i32
    return %c0_i32, %c0_i32_0 : i32, i32
  }
  func.func @transform_5(%arg0: i32) -> (i32, i32) {
    %c0_i32 = arith.constant 0 : i32
    %c0_i32_0 = arith.constant 0 : i32
    %c0_i32_1 = arith.constant 0 : i32
    return %c0_i32, %c0_i32_0 : i32, i32
  }
  func.func @transform_6(%arg0: i32) -> (i32, i32) {
    %c0_i32 = arith.constant 0 : i32
    %c0_i32_0 = arith.constant 0 : i32
    %c0_i32_1 = arith.constant 0 : i32
    return %c0_i32, %c0_i32_0 : i32, i32
  }
  func.func @transform_7(%arg0: i32) -> (i32, i32) {
    %c0_i32 = arith.constant 0 : i32
    %c0_i32_0 = arith.constant 0 : i32
    return %arg0, %c0_i32 : i32, i32
  }
}

</mosaic_0001>

<bundles_post_ra>
// kernel: tpu_custom_call.1
= control target key start
LH: loop header
LB: loop body
LE: loop exit
PB: predicated region body
PF: predicated region fallthrough
CT: control target
= control target key end

     0   :  { %12 = vsyncpa [#allocation3], 0  ;;  %s1822_s0 = inlined_call_operand.hbm [shape: f32[16,784], index: 0, kind: input, shape index: {}]   ;;  %s1823_s1 = inlined_call_operand.hbm [shape: bf16[784,256], index: 1, kind: input, shape index: {}]   ;;  %s1824_s2 = inlined_call_operand.vmem [shape: f32[1,256], index: 2, kind: input, shape index: {}]   ;;  %s1825_s3 = inlined_call_operand.hbm [shape: bf16[256,128], index: 3, kind: input, shape index: {}]   ;;  %s1826_s4 = inlined_call_operand.vmem [shape: f32[1,128], index: 4, kind: input, shape index: {}]   ;;  %s1827_s5 = inlined_call_operand.hbm [shape: bf16[128,128], index: 5, kind: input, shape index: {}]   ;;  %s1828_s6 = inlined_call_operand.vmem [shape: f32[1,128], index: 6, kind: input, shape index: {}]   ;;  %s1829_s7 = inlined_call_operand.hbm [shape: f32[16,128], index: 7, kind: output, shape index: {}]  }
   0x1   :  { %13 = vsyncpa [#allocation6], 0 }
   0x2   :  { %14 = vsyncpa [#allocation9], 0 }
   0x3   :  { %15 = vsyncpa [#allocation4], 0  ;;  %s1693_s24 = smov [#allocation5]   ;;  %s1575_s28 = scalar_lea.hbm %s1823_s1, 12544 }
   0x4   :  { %s33_s25 = sshll.u32 %s1693_s24, 4  ;;  %p1576_p0 = scmp.ne.s32.totalorder %s1823_s1, %s1575_s28  ;;  %s34_s25 = int_to_ptr.vmem [resolvable:$true] %s33_s25 }
   0x5   :  { %p1579_p1 = scmp.lt.u32.totalorder %s1575_s28, %s1823_s1 }
   0x7   :  { %p1581_p2 = pnand %p1579_p1, %p1576_p0 }
   0x9   :  { %1584 = shalt.err (!%p1581_p2)
}
   0xa   :  { %s1585_s10 = scalar_lea.vmem %s34_s25, 12544  ;;  %p1590_p4 = scmp.lt.s32.totalorder %s34_s25, %s34_s25 }
   0xb   :  { %p1586_p3 = scmp.ne.s32.totalorder %s34_s25, %s1585_s10  ;;  %p1591_p5 = scmp.lt.s32.totalorder %s1585_s10, %s1585_s10 }
   0xd   :  { %p1592_p6 = por %p1591_p5, %p1590_p4 }
   0xf   :  { %p1593_p7 = pnand %p1592_p6, %p1586_p3 }
  0x11   :  { %1596 = shalt.err (!%p1593_p7)
}
  0x12   :  { %s1694_s11 = smov 128   ;;  %s1695_s12 = smov 8  }
  0x13   :  { %39 = dma.hbm_to_vmem [thread:$0]  %s1823_s1, 12544, %s34_s25, [#allocation6], %s1694_s11, %s1694_s11, %s1695_s12  }
  0x14   :  { %s1696_s15 = smov [#allocation2]   ;;  %s1597_s19 = scalar_lea.hbm %s1822_s0, 1792 }
  0x15   :  { %s21_s16 = sshll.u32 %s1696_s15, 4  ;;  %p1598_p8 = scmp.ne.s32.totalorder %s1822_s0, %s1597_s19  ;;  %s22_s16 = int_to_ptr.vmem [resolvable:$true] %s21_s16 }
  0x16   :  { %p1601_p9 = scmp.lt.u32.totalorder %s1597_s19, %s1822_s0 }
  0x18   :  { %p1603_p10 = pnand %p1601_p9, %p1598_p8 }
  0x1a   :  { %1606 = shalt.err (!%p1603_p10)
}
  0x1b   :  { %s1607_s24 = scalar_lea.vmem %s22_s16, 1792  ;;  %p1612_p12 = scmp.lt.s32.totalorder %s22_s16, %s22_s16 }
  0x1c   :  { %p1608_p11 = scmp.ne.s32.totalorder %s22_s16, %s1607_s24  ;;  %p1613_p13 = scmp.lt.s32.totalorder %s1607_s24, %s1607_s24 }
  0x1e   :  { %p1614_p0 = por %p1613_p13, %p1612_p12 }
  0x20   :  { %p1615_p1 = pnand %p1614_p0, %p1608_p11 }
  0x22   :  { %1618 = shalt.err (!%p1615_p1)
}
  0x23   :  { %s1697_s1 = smov 896   ;;  %s1698_s25 = smov 56  }
  0x24   :  { %27 = dma.hbm_to_vmem [thread:$0]  %s1822_s0, 1792, %s22_s16, [#allocation3], %s1697_s1, %s1697_s1, %s1698_s25  }
  0x25   :  { %s1699_s28 = smov [#allocation7]   ;;  %s1619_s9 = scalar_lea.hbm %s1825_s3, 2048 }
  0x26   :  { %s47_s29 = sshll.u32 %s1699_s28, 4  ;;  %p1620_p2 = scmp.ne.s32.totalorder %s1825_s3, %s1619_s9  ;;  %s48_s29 = int_to_ptr.vmem [resolvable:$true] %s47_s29 }
  0x27   :  { %p1623_p3 = scmp.lt.u32.totalorder %s1619_s9, %s1825_s3 }
  0x29   :  { %p1625_p4 = pnand %p1623_p3, %p1620_p2 }
  0x2b   :  { %1628 = shalt.err (!%p1625_p4)
}
  0x2c   :  { %s1629_s17 = scalar_lea.vmem %s48_s29, 2048  ;;  %p1634_p6 = scmp.lt.s32.totalorder %s48_s29, %s48_s29 }
  0x2d   :  { %p1630_p5 = scmp.ne.s32.totalorder %s48_s29, %s1629_s17  ;;  %p1635_p7 = scmp.lt.s32.totalorder %s1629_s17, %s1629_s17 }
  0x2f   :  { %p1636_p8 = por %p1635_p7, %p1634_p6 }
  0x31   :  { %p1637_p9 = pnand %p1636_p8, %p1630_p5 }
  0x33   :  { %1640 = shalt.err (!%p1637_p9)
}
  0x34   :  { %s1700_s0 = smov 64   ;;  %s1701_s16 = smov 4  }
  0x35   :  { %53 = dma.hbm_to_vmem [thread:$0]  %s1825_s3, 2048, %s48_s29, [#allocation6], %s1700_s0, %s1700_s0, %s1701_s16  }
  0x36   :  { %s1702_s20 = smov [#allocation8]   ;;  %s1641_s24 = scalar_lea.hbm %s1827_s5, 1024 }
  0x37   :  { %s61_s21 = sshll.u32 %s1702_s20, 4  ;;  %p1642_p10 = scmp.ne.s32.totalorder %s1827_s5, %s1641_s24  ;;  %s62_s21 = int_to_ptr.vmem [resolvable:$true] %s61_s21 }
  0x38   :  { %p1645_p11 = scmp.lt.u32.totalorder %s1641_s24, %s1827_s5 }
  0x3a   :  { %p1647_p12 = pnand %p1645_p11, %p1642_p10 }
  0x3c   :  { %1650 = shalt.err (!%p1647_p12)
}
  0x3d   :  { %s1651_s28 = scalar_lea.vmem %s62_s21, 1024  ;;  %p1656_p0 = scmp.lt.s32.totalorder %s62_s21, %s62_s21 }
  0x3e   :  { %p1652_p13 = scmp.ne.s32.totalorder %s62_s21, %s1651_s28  ;;  %p1657_p1 = scmp.lt.s32.totalorder %s1651_s28, %s1651_s28 }
  0x40   :  { %p1658_p2 = por %p1657_p1, %p1656_p0 }
  0x42   :  { %p1659_p3 = pnand %p1658_p2, %p1652_p13 }
  0x44   :  { %1662 = shalt.err (!%p1659_p3)
}
  0x45   :  { %67 = dma.hbm_to_vmem [thread:$0]  %s1827_s5, 1024, %s62_s21, [#allocation9], %s1700_s0, %s1700_s0, %s1701_s16  }
  0x46   :  { %1685 = dma.done.wait [#allocation3], 1792  }
  0x47   :  { %1686 = vsyncadd [#allocation3], 4294965504 }
  0x48   :  { %1687 = dma.done.wait [#allocation6], 14592  }
  0x49   :  { %1688 = vsyncadd [#allocation6], 4294952704 }
  0x4a   :  { %1689 = dma.done.wait [#allocation9], 1024  }
  0x4b   :  { %1690 = vsyncadd [#allocation9], 4294966272  ;;  %v1404_v0 = vld [vmem:[#allocation5 + $0x104] ss:$8 sps:$4 sm:$0xff]   ;;  %v1406_v1 = vld [vmem:[#allocation5 + $0x100] ss:$8 sps:$4 sm:$0xff]  }
  0x4c   :  { %751 = vmatprep.subr.bf16.mxu0 %v1404_v0  ;;  %v1407_v2 = vld [vmem:[#allocation5 + $0x114] ss:$8 sps:$4 sm:$0xff]   ;;  %v1409_v3 = vld [vmem:[#allocation5 + $0x110] ss:$8 sps:$4 sm:$0xff]   ;;  %v1410_v4 = vld [vmem:[#allocation5 + $0x124] ss:$8 sps:$4 sm:$0xff]  }
  0x4d   :  { %752 = vmatpush1.bf16.msra.mxu0 %v1406_v1  ;;  %v1412_v5 = vld [vmem:[#allocation5 + $0x120] ss:$8 sps:$4 sm:$0xff]   ;;  %v1413_v6 = vld [vmem:[#allocation5 + $0x134] ss:$8 sps:$4 sm:$0xff]   ;;  %v1415_v7 = vld [vmem:[#allocation5 + $0x130] ss:$8 sps:$4 sm:$0xff]  }
  0x4e   :  { %753 = vmatprep.subr.bf16.mxu0 %v1407_v2  ;;  %v1416_v8 = vld [vmem:[#allocation5 + $0x144] ss:$8 sps:$4 sm:$0xff]   ;;  %v1418_v9 = vld [vmem:[#allocation5 + $0x140] ss:$8 sps:$4 sm:$0xff]   ;;  %v1419_v10 = vld [vmem:[#allocation5 + $0x154] ss:$8 sps:$4 sm:$0xff]  }
  0x4f   :  { %v1421_v11 = vld [vmem:[#allocation5 + $0x150] ss:$8 sps:$4 sm:$0xff]   ;;  %v1422_v12 = vld [vmem:[#allocation5 + $0x164] ss:$8 sps:$4 sm:$0xff]   ;;  %v1424_v16 = vld [vmem:[#allocation5 + $0x160] ss:$8 sps:$4 sm:$0xff]  }
  0x50   :  { %v86_v13 = vld [vmem:[#allocation2 + $0x18] sm:$0xff]  ;;  %v93_v14 = vld [vmem:[#allocation2 + $0x50] sm:$0xff]  ;;  %v1425_v17 = vld [vmem:[#allocation5 + $0x174] ss:$8 sps:$4 sm:$0xff]   ;;  %vm704_vm0 = vcmask 130048   ;;  %vm1705_vm1 = vmmov 0  }
  0x51   :  { %754 = vmatpush1.bf16.msra.mxu0 %v1409_v3  ;;  %v100_v15 = vpack.c.bf16 %v93_v14, %v86_v13  ;;  %v1458_v18 = vld [vmem:[#allocation5 + $0x4] ss:$8 sps:$4 sm:$0xff]   ;;  %v1427_v19 = vld [vmem:[#allocation5 + $0x170] ss:$8 sps:$4 sm:$0xff]   ;;  %v1463_v21 = vld [vmem:[#allocation5] ss:$8 sps:$4 sm:$0xff]  }
  0x52   :  { %755 = vmatprep.subr.bf16.mxu0 %v1410_v4  ;;  %v1428_v20 = vld [vmem:[#allocation5 + $0x184] ss:$8 sps:$4 sm:$0xff]   ;;  %708 = vmatprep.subr.bf16.mxu1 %v1458_v18  ;;  %v1464_v22 = vld [vmem:[#allocation5 + $0x14] ss:$8 sps:$4 sm:$0xff]   ;;  %v1430_v23 = vld [vmem:[#allocation5 + $0x180] ss:$8 sps:$4 sm:$0xff]  }
  0x53   :  { %783 = vmatprep.mubr.bf16.mxu0 %v100_v15  ;;  %709 = vmatpush1.bf16.msra.mxu1 %v1463_v21  ;;  %v1469_v24 = vld [vmem:[#allocation5 + $0x10] ss:$8 sps:$4 sm:$0xff]   ;;  %v1470_v25 = vld [vmem:[#allocation5 + $0x24] ss:$8 sps:$4 sm:$0xff]   ;;  %v1431_v26 = vld [vmem:[#allocation5 + $0x194] ss:$8 sps:$4 sm:$0xff]  }
  0x54   :  { %710 = vmatprep.subr.bf16.mxu1 %v1464_v22  ;;  %v1475_v27 = vld [vmem:[#allocation5 + $0x20] ss:$8 sps:$4 sm:$0xff]   ;;  %v1476_v28 = vld [vmem:[#allocation5 + $0x34] ss:$8 sps:$4 sm:$0xff]   ;;  %v1433_v29 = vld [vmem:[#allocation5 + $0x190] ss:$8 sps:$4 sm:$0xff]  }
  0x55   :  { %756 = vmatpush1.bf16.msra.mxu0 %v1412_v5  ;;  %v1434_v30 = vld [vmem:[#allocation5 + $0x1a4] ss:$8 sps:$4 sm:$0xff]   ;;  %v1481_v31 = vld [vmem:[#allocation5 + $0x30] ss:$8 sps:$4 sm:$0xff]   ;;  %v1436_v33 = vld [vmem:[#allocation5 + $0x1a0] ss:$8 sps:$4 sm:$0xff]  }
  0x56   :  { %757 = vmatprep.subr.bf16.mxu0 %v1413_v6  ;;  %v1482_v32 = vld [vmem:[#allocation5 + $0x44] ss:$8 sps:$4 sm:$0xff]   ;;  %v1437_v34 = vld [vmem:[#allocation5 + $0x1b4] ss:$8 sps:$4 sm:$0xff]   ;;  %v1487_v35 = vld [vmem:[#allocation5 + $0x40] ss:$8 sps:$4 sm:$0xff]  }
  0x57   :  { %711 = vmatpush1.bf16.msra.mxu1 %v1469_v24  ;;  %v1488_v36 = vld [vmem:[#allocation5 + $0x54] ss:$8 sps:$4 sm:$0xff]   ;;  %v1439_v37 = vld [vmem:[#allocation5 + $0x1b0] ss:$8 sps:$4 sm:$0xff]   ;;  %v1440_v38 = vld [vmem:[#allocation5 + $0x1c4] ss:$8 sps:$4 sm:$0xff]  }
  0x58   :  { %712 = vmatprep.subr.bf16.mxu1 %v1470_v25  ;;  %v1493_v39 = vld [vmem:[#allocation5 + $0x50] ss:$8 sps:$4 sm:$0xff]   ;;  %v1494_v40 = vld [vmem:[#allocation5 + $0x64] ss:$8 sps:$4 sm:$0xff]   ;;  %v1442_v41 = vld [vmem:[#allocation5 + $0x1c0] ss:$8 sps:$4 sm:$0xff]  }
  0x59   :  { %758 = vmatpush1.bf16.msra.mxu0 %v1415_v7  ;;  %v1443_v42 = vld [vmem:[#allocation5 + $0x1d4] ss:$8 sps:$4 sm:$0xff]   ;;  %v1499_v43 = vld [vmem:[#allocation5 + $0x60] ss:$8 sps:$4 sm:$0xff]   ;;  %v1445_v45 = vld [vmem:[#allocation5 + $0x1d0] ss:$8 sps:$4 sm:$0xff]  }
  0x5a   :  { %759 = vmatprep.subr.bf16.mxu0 %v1416_v8  ;;  %v1500_v44 = vld [vmem:[#allocation5 + $0x74] ss:$8 sps:$4 sm:$0xff]   ;;  %v1446_v46 = vld [vmem:[#allocation5 + $0x1e4] ss:$8 sps:$4 sm:$0xff]   ;;  %v1505_v47 = vld [vmem:[#allocation5 + $0x70] ss:$8 sps:$4 sm:$0xff]  }
  0x5b   :  { %713 = vmatpush1.bf16.msra.mxu1 %v1475_v27  ;;  %v1506_v48 = vld [vmem:[#allocation5 + $0x84] ss:$8 sps:$4 sm:$0xff]   ;;  %v1448_v49 = vld [vmem:[#allocation5 + $0x1e0] ss:$8 sps:$4 sm:$0xff]   ;;  %v1449_v50 = vld [vmem:[#allocation5 + $0x1f4] ss:$8 sps:$4 sm:$0xff]  }
  0x5c   :  { %714 = vmatprep.subr.bf16.mxu1 %v1476_v28  ;;  %v1511_v51 = vld [vmem:[#allocation5 + $0x80] ss:$8 sps:$4 sm:$0xff]   ;;  %v1512_v52 = vld [vmem:[#allocation5 + $0x94] ss:$8 sps:$4 sm:$0xff]   ;;  %v1451_v53 = vld [vmem:[#allocation5 + $0x1f0] ss:$8 sps:$4 sm:$0xff]  }
  0x5d   :  { %760 = vmatpush1.bf16.msra.mxu0 %v1418_v9  ;;  %v85_v54 = vld [vmem:[#allocation2 + $0x10] sm:$0xff]  ;;  %v92_v55 = vld [vmem:[#allocation2 + $0x48] sm:$0xff]  ;;  %v95_v62 = vld [vmem:[#allocation2 + $0x60] sm:$0xff]  ;;  %s1706_s13 = smov [#allocation10]  }
  0x5e   :  { %761 = vmatprep.subr.bf16.mxu0 %v1419_v10  ;;  %v1454_v56 = vld [vmem:[#allocation5 + $0x204] ss:$8 sps:$4 sm:$0xff]   ;;  %v1517_v57 = vld [vmem:[#allocation5 + $0x90] ss:$8 sps:$4 sm:$0xff]   ;;  %v1452_v58 = vld [vmem:[#allocation5 + $0x200] ss:$8 sps:$4 sm:$0xff]   ;;  %v99_v59 = vpack.c.bf16 %v92_v55, %v85_v54 }
  0x5f   :  { %715 = vmatpush1.bf16.msra.mxu1 %v1481_v31  ;;  %v1518_v60 = vld [vmem:[#allocation5 + $0xa4] ss:$8 sps:$4 sm:$0xff]   ;;  %v88_v61 = vld [vmem:[#allocation2 + $0x28] sm:$0xff]  ;;  %v1523_v1 = vld [vmem:[#allocation5 + $0xa0] ss:$8 sps:$4 sm:$0xff]   ;;  %s1184_s14 = sshll.u32 %s1706_s13, 4  ;;  %s1185_s14 = int_to_ptr.vmem [resolvable:$true] %s1184_s14 }
  0x60   :  { %716 = vmatprep.subr.bf16.mxu1 %v1482_v32  ;;  %v1457_v63 = vld [vmem:[#allocation5 + $0x214] ss:$8 sps:$4 sm:$0xff]   ;;  %v102_v0 = vpack.c.bf16 %v95_v62, %v88_v61  ;;  %v1455_v3 = vld [vmem:[#allocation5 + $0x210] ss:$8 sps:$4 sm:$0xff]   ;;  %v1462_v4 = vld [vmem:[#allocation5 + $0x224] ss:$8 sps:$4 sm:$0xff]   ;;  %p1668_p5 = scmp.lt.s32.totalorder %s1185_s14, %s1185_s14 }
  0x61   :  { %762 = vmatpush1.bf16.msra.mxu0 %v1421_v11  ;;  %v1524_v2 = vld [vmem:[#allocation5 + $0xb4] ss:$8 sps:$4 sm:$0xff]   ;;  %v1529_v7 = vld [vmem:[#allocation5 + $0xb0] ss:$8 sps:$4 sm:$0xff]   ;;  %v1530_v9 = vld [vmem:[#allocation5 + $0xc4] ss:$8 sps:$4 sm:$0xff]  }
  0x62   :  { %763 = vmatprep.subr.bf16.mxu0 %v1422_v12  ;;  %v84_v5 = vld [vmem:[#allocation2 + $0x8] sm:$0xff]  ;;  %v91_v6 = vld [vmem:[#allocation2 + $0x40] sm:$0xff]  ;;  %v1460_v10 = vld [vmem:[#allocation5 + $0x220] ss:$8 sps:$4 sm:$0xff]   ;;  %v1703_v61 = vmov 0  }
  0x63   :  { %717 = vmatpush1.bf16.msra.mxu1 %v1487_v35  ;;  %v98_v8 = vpack.c.bf16 %v91_v6, %v84_v5  ;;  %v1468_v11 = vld [vmem:[#allocation5 + $0x234] ss:$8 sps:$4 sm:$0xff]   ;;  %v1535_v12 = vld [vmem:[#allocation5 + $0xc0] ss:$8 sps:$4 sm:$0xff]   ;;  %v1466_v14 = vld [vmem:[#allocation5 + $0x230] ss:$8 sps:$4 sm:$0xff]  }
  0x64   :  { %718 = vmatprep.subr.bf16.mxu1 %v1488_v36  ;;  %v1536_v13 = vld [vmem:[#allocation5 + $0xd4] ss:$8 sps:$4 sm:$0xff]   ;;  %v1474_v15 = vld [vmem:[#allocation5 + $0x244] ss:$8 sps:$4 sm:$0xff]   ;;  %v1478_v22 = vld [vmem:[#allocation5 + $0x250] ss:$8 sps:$4 sm:$0xff]  }
  0x65   :  { %764 = vmatpush1.bf16.msra.mxu0 %v1424_v16  ;;  %740 = vmatprep.mubr.bf16.mxu1 %v98_v8  ;;  %v1472_v16 = vld [vmem:[#allocation5 + $0x240] ss:$8 sps:$4 sm:$0xff]   ;;  %v1480_v18 = vld [vmem:[#allocation5 + $0x254] ss:$8 sps:$4 sm:$0xff]   ;;  %v1550_v24 = vld [vmem:[#allocation5 + $0xf0] ss:$8 sps:$4 sm:$0xff]  }
  0x66   :  { %765 = vmatprep.subr.bf16.mxu0 %v1425_v17  ;;  %v1541_v17 = vld [vmem:[#allocation5 + $0xd0] ss:$8 sps:$4 sm:$0xff]   ;;  %v1548_v21 = vld [vmem:[#allocation5 + $0xf4] ss:$8 sps:$4 sm:$0xff]   ;;  %v1484_v28 = vld [vmem:[#allocation5 + $0x260] ss:$8 sps:$4 sm:$0xff]  }
  0x67   :  { %719 = vmatpush1.bf16.msra.mxu1 %v1493_v39  ;;  %v83_v25 = vld [vmem:[#allocation2] sm:$0xff]  ;;  %v1553_v32 = vld [vmem:[#allocation7 + $0x48] sm:$0xff]   ;;  %v1555_v36 = vld [vmem:[#allocation7 + $0x50] sm:$0xff]   ;;  %v1704_v8 = vmov 0.0  }
  0x68   :  { %720 = vmatprep.subr.bf16.mxu1 %v1494_v40  ;;  %v1551_v27 = vld [vmem:[#allocation7 + $0x40] sm:$0xff]   ;;  %v1554_v35 = vld [vmem:[#allocation7 + $0x8] sm:$0xff]   ;;  %v1556_v39 = vld [vmem:[#allocation7 + $0x10] sm:$0xff]  }
  0x69   :  { %766 = vmatpush1.bf16.msra.mxu0 %v1427_v19  ;;  %v1542_v19 = vld [vmem:[#allocation5 + $0xe4] ss:$8 sps:$4 sm:$0xff]   ;;  %v1552_v31 = vld [vmem:[#allocation7] sm:$0xff]  }
  0x6a   :  { %767 = vmatprep.subr.bf16.mxu0 %v1428_v20  ;;  %v1547_v20 = vld [vmem:[#allocation5 + $0xe0] ss:$8 sps:$4 sm:$0xff]   ;;  %v1540_v54 = vld [vmem:[#allocation5 + $0x2f4] ss:$8 sps:$4 sm:$0xff]   ;;  %v1538_v55 = vld [vmem:[#allocation5 + $0x2f0] ss:$8 sps:$4 sm:$0xff]  }
  0x6b   :  { %721 = vmatpush1.bf16.msra.mxu1 %v1499_v43  ;;  %v1557_v40 = vld [vmem:[#allocation7 + $0x58] sm:$0xff]   ;;  %v89_v62 = vld [vmem:[#allocation2 + $0x30] sm:$0xff] }
  0x6c   :  { %722 = vmatprep.subr.bf16.mxu1 %v1500_v44  ;;  %v1558_v43 = vld [vmem:[#allocation7 + $0x18] sm:$0xff]   ;;  %v1559_v44 = vld [vmem:[#allocation7 + $0x60] sm:$0xff]   ;;  %v1564_v5 = vld [vmem:[#allocation7 + $0x30] sm:$0xff]  }
  0x6d   :  { %768 = vmatpush1.bf16.msra.mxu0 %v1430_v23  ;;  %v1486_v23 = vld [vmem:[#allocation5 + $0x264] ss:$8 sps:$4 sm:$0xff]  }
  0x6e   :  { %769 = vmatprep.subr.bf16.mxu0 %v1431_v26  ;;  %v90_v26 = vld [vmem:[#allocation2 + $0x38] sm:$0xff] }
  0x6f   :  { %723 = vmatpush1.bf16.msra.mxu1 %v1505_v47  ;;  %v1514_v47 = vld [vmem:[#allocation5 + $0x2b0] ss:$8 sps:$4 sm:$0xff]   ;;  %v1565_v6 = vld [vmem:[#allocation7 + $0x78] sm:$0xff]  }
  0x70   :  { %724 = vmatprep.subr.bf16.mxu1 %v1506_v48  ;;  %v1522_v48 = vld [vmem:[#allocation5 + $0x2c4] ss:$8 sps:$4 sm:$0xff]  }
  0x71   :  { %770 = vmatpush1.bf16.msra.mxu0 %v1433_v29  ;;  %v1492_v29 = vld [vmem:[#allocation5 + $0x274] ss:$8 sps:$4 sm:$0xff]  }
  0x72   :  { %771 = vmatprep.subr.bf16.mxu0 %v1434_v30  ;;  %v97_v30 = vpack.c.bf16 %v90_v26, %v83_v25 }
  0x73   :  { %725 = vmatpush1.bf16.msra.mxu1 %v1511_v51  ;;  %v1526_v51 = vld [vmem:[#allocation5 + $0x2d0] ss:$8 sps:$4 sm:$0xff]  }
  0x74   :  { %726 = vmatprep.subr.bf16.mxu1 %v1512_v52  ;;  %v1534_v52 = vld [vmem:[#allocation5 + $0x2e4] ss:$8 sps:$4 sm:$0xff]  }
  0x75   :  { %772 = vmatpush1.bf16.msra.mxu0 %v1436_v33  ;;  %v1490_v33 = vld [vmem:[#allocation5 + $0x270] ss:$8 sps:$4 sm:$0xff]  }
  0x76   :  { %773 = vmatprep.subr.bf16.mxu0 %v1437_v34  ;;  %v1498_v34 = vld [vmem:[#allocation5 + $0x284] ss:$8 sps:$4 sm:$0xff]  }
  0x77   :  { %727 = vmatpush1.bf16.msra.mxu1 %v1517_v57  ;;  %v94_v57 = vld [vmem:[#allocation2 + $0x58] sm:$0xff] }
  0x78   :  { %728 = vmatprep.subr.bf16.mxu1 %v1518_v60  ;;  %v1544_v60 = vld [vmem:[#allocation5 + $0x300] ss:$8 sps:$4 sm:$0xff]  }
  0x79   :  { %774 = vmatpush1.bf16.msra.mxu0 %v1439_v37  ;;  %v1496_v37 = vld [vmem:[#allocation5 + $0x280] ss:$8 sps:$4 sm:$0xff]  }
  0x7a   :  { %775 = vmatprep.subr.bf16.mxu0 %v1440_v38  ;;  %v1504_v38 = vld [vmem:[#allocation5 + $0x294] ss:$8 sps:$4 sm:$0xff]  }
  0x7b   :  { %729 = vmatpush1.bf16.msra.mxu1 %v1523_v1  ;;  %v1560_v1 = vld [vmem:[#allocation7 + $0x20] sm:$0xff]  }
  0x7c   :  { %730 = vmatprep.subr.bf16.mxu1 %v1524_v2  ;;  %v1561_v2 = vld [vmem:[#allocation7 + $0x68] sm:$0xff]  }
  0x7d   :  { %776 = vmatpush1.bf16.msra.mxu0 %v1442_v41  ;;  %v1502_v41 = vld [vmem:[#allocation5 + $0x290] ss:$8 sps:$4 sm:$0xff]  }
  0x7e   :  { %777 = vmatprep.subr.bf16.mxu0 %v1443_v42  ;;  %v1510_v42 = vld [vmem:[#allocation5 + $0x2a4] ss:$8 sps:$4 sm:$0xff]  }
  0x7f   :  { %731 = vmatpush1.bf16.msra.mxu1 %v1529_v7  ;;  %v1566_v7 = vld [vmem:[#allocation7 + $0x38] sm:$0xff]  }
  0x80   :  { %732 = vmatprep.subr.bf16.mxu1 %v1530_v9 }
  0x81   :  { %778 = vmatpush1.bf16.msra.mxu0 %v1445_v45  ;;  %v1508_v45 = vld [vmem:[#allocation5 + $0x2a0] ss:$8 sps:$4 sm:$0xff]  }
  0x82   :  { %779 = vmatprep.subr.bf16.mxu0 %v1446_v46  ;;  %v1516_v46 = vld [vmem:[#allocation5 + $0x2b4] ss:$8 sps:$4 sm:$0xff]  }
  0x83   :  { %733 = vmatpush1.bf16.msra.mxu1 %v1535_v12 }
  0x84   :  { %734 = vmatprep.subr.bf16.mxu1 %v1536_v13  ;;  %v204_v13 = vlaneseq }
  0x85   :  { %780 = vmatpush1.bf16.msra.mxu0 %v1448_v49  ;;  %v1520_v49 = vld [vmem:[#allocation5 + $0x2c0] ss:$8 sps:$4 sm:$0xff]  }
  0x86   :  { %781 = vmatprep.subr.bf16.mxu0 %v1449_v50  ;;  %v1528_v50 = vld [vmem:[#allocation5 + $0x2d4] ss:$8 sps:$4 sm:$0xff]  }
  0x87   :  { %735 = vmatpush1.bf16.msra.mxu1 %v1541_v17 }
  0x88   :  { %736 = vmatprep.subr.bf16.mxu1 %v1542_v19 }
  0x89   :  { %782 = vmatpush1.bf16.msra.mxu0 %v1451_v53  ;;  %v1532_v53 = vld [vmem:[#allocation5 + $0x2e0] ss:$8 sps:$4 sm:$0xff]  }
  0x8a   :  { %794 = vmatprep.subr.bf16.mxu0 %v1454_v56  ;;  %v87_v56 = vld [vmem:[#allocation2 + $0x20] sm:$0xff] }
  0x8b   :  { %737 = vmatpush1.bf16.msra.mxu1 %v1547_v20 }
  0x8c   :  { %784 = vmatmul.mubr.bf16.vlgmr.msra.gmra.mrb[0].mxu0 %v99_v59  ;;  %738 = vmatprep.subr.bf16.mxu1 %v1548_v21  ;;  %v101_v59 = vpack.c.bf16 %v94_v57, %v87_v56 }
  0x8d   :  { %795 = vmatpush1.bf16.msra.mxu0 %v1452_v58  ;;  %826 = vmatprep.mubr.bf16.mxu0 %v102_v0  ;;  %v1546_v58 = vld [vmem:[#allocation5 + $0x304] ss:$8 sps:$4 sm:$0xff]  }
  0x8e   :  { %796 = vmatprep.subr.bf16.mxu0 %v1457_v63  ;;  %v96_v63 = vld [vmem:[#allocation2 + $0x68] sm:$0xff] }
  0x8f   :  { %739 = vmatpush1.bf16.msra.mxu1 %v1550_v24  ;;  %v103_v0 = vpack.c.bf16 %v96_v63, %v89_v62 }
  0x90   :  { %1323 = vmatprep.subr.bf16.mxu1 %v1551_v27 }
  0x91   :  { %797 = vmatpush1.bf16.msra.mxu0 %v1455_v3  ;;  %v1562_v3 = vld [vmem:[#allocation7 + $0x28] sm:$0xff]  }
  0x92   :  { %798 = vmatprep.subr.bf16.mxu0 %v1462_v4  ;;  %741 = vmatmul.mubr.bf16.vlgmr.msra.gmra.mrb[0].mxu1 %v97_v30  ;;  %v1563_v4 = vld [vmem:[#allocation7 + $0x70] sm:$0xff]  }
  0x93   :  { %1324 = vmatpush3.bf16.msra.mxu1 %v1552_v31 }
  0x94   :  { %1325 = vmatprep.subr.bf16.mxu1 %v1553_v32 }
  0x95   :  { %799 = vmatpush1.bf16.msra.mxu0 %v1460_v10 }
  0x96   :  { %800 = vmatprep.subr.bf16.mxu0 %v1468_v11 }
  0x97   :  { %1326 = vmatpush3.bf16.msra.mxu1 %v1554_v35 }
  0x98   :  { %1327 = vmatprep.subr.bf16.mxu1 %v1555_v36 }
  0x99   :  { %801 = vmatpush1.bf16.msra.mxu0 %v1466_v14  ;;  %v205_v14 = vshrl.u32 %v204_v13, 7 }
  0x9a   :  { %802 = vmatprep.subr.bf16.mxu0 %v1474_v15 }
  0x9b   :  { %1328 = vmatpush3.bf16.msra.mxu1 %v1556_v39  ;;  %v206_v15 = vsub.s32 0, %v205_v14  ;;  %v210_v17 = vsub.s32 1, %v205_v14  ;;  %v1568_v39 = vld [vmem:[#allocation8 + $0x8] sm:$0xff]  }
  0x9c   :  { %1329 = vmatprep.subr.bf16.mxu1 %v1557_v40  ;;  %v1569_v40 = vld [vmem:[#allocation8 + $0x10] sm:$0xff]  }
  0x9d   :  { %803 = vmatpush1.bf16.msra.mxu0 %v1472_v16  ;;  %v202_v16 = vld [vmem:[%s1824_s2] sm:$0x3] }
  0x9e   :  { %804 = vmatprep.subr.bf16.mxu0 %v1480_v18  ;;  %v207_v18 = vrot.slane %v202_v16, %v206_v15  ;;  %v211_v19 = vrot.slane %v202_v16, %v210_v17 }
  0x9f   :  { %1330 = vmatpush3.bf16.msra.mxu1 %v1558_v43  ;;  %v1572_v43 = vld [vmem:[#allocation8 + $0x28] sm:$0xff]  }
  0xa0   :  { %1331 = vmatprep.subr.bf16.mxu1 %v1559_v44  ;;  %v1573_v44 = vld [vmem:[#allocation8 + $0x30] sm:$0xff]  }
  0xa1   :  { %805 = vmatpush1.bf16.msra.mxu0 %v1478_v22 }
  0xa2   :  { %806 = vmatprep.subr.bf16.mxu0 %v1486_v23 }
  0xa3   :  { %1332 = vmatpush3.bf16.msra.mxu1 %v1560_v1 }
  0xa4   :  { %1333 = vmatprep.subr.bf16.mxu1 %v1561_v2 }
  0xa5   :  { %807 = vmatpush1.bf16.msra.mxu0 %v1484_v28 }
  0xa6   :  { %808 = vmatprep.subr.bf16.mxu0 %v1492_v29 }
  0xa7   :  { %1334 = vmatpush3.bf16.msra.mxu1 %v1562_v3 }
  0xa8   :  { %1335 = vmatprep.subr.bf16.mxu1 %v1563_v4 }
  0xa9   :  { %809 = vmatpush1.bf16.msra.mxu0 %v1490_v33 }
  0xaa   :  { %810 = vmatprep.subr.bf16.mxu0 %v1498_v34 }
  0xab   :  { %1336 = vmatpush3.bf16.msra.mxu1 %v1564_v5 }
  0xac   :  { %1337 = vmatprep.subr.bf16.mxu1 %v1565_v6 }
  0xad   :  { %811 = vmatpush1.bf16.msra.mxu0 %v1496_v37 }
  0xae   :  { %812 = vmatprep.subr.bf16.mxu0 %v1504_v38  ;;  %v1567_v38 = vld [vmem:[#allocation8] sm:$0xff]  }
  0xaf   :  { %1338 = vmatpush3.bf16.msra.mxu1 %v1566_v7 }
  0xb0   :  { %1354 = vmatprep.subr.bf16.mxu1 %v1704_v8 }
  0xb1   :  { %813 = vmatpush1.bf16.msra.mxu0 %v1502_v41  ;;  %v1570_v41 = vld [vmem:[#allocation8 + $0x18] sm:$0xff]  }
  0xb2   :  { %814 = vmatprep.subr.bf16.mxu0 %v1510_v42  ;;  %v1571_v42 = vld [vmem:[#allocation8 + $0x20] sm:$0xff]  }
  0xb5   :  { %815 = vmatpush1.bf16.msra.mxu0 %v1508_v45  ;;  %v1574_v45 = vld [vmem:[#allocation8 + $0x38] sm:$0xff]  }
  0xb6   :  { %816 = vmatprep.subr.bf16.mxu0 %v1516_v46 }
  0xb9   :  { %817 = vmatpush1.bf16.msra.mxu0 %v1514_v47  ;;  %v1297_v47 = vld [vmem:[%s1826_s4] ss:$0 sm:$0xff]  ;;  %s1663_s4 = scalar_lea.vmem %s1185_s14, 256 }
  0xba   :  { %818 = vmatprep.subr.bf16.mxu0 %v1522_v48  ;;  %p1664_p4 = scmp.ne.s32.totalorder %s1185_s14, %s1663_s4  ;;  %p1669_p6 = scmp.lt.s32.totalorder %s1663_s4, %s1663_s4 }
  0xbc   :  { %p1670_p7 = por %p1669_p6, %p1668_p5 }
  0xbd   :  { %819 = vmatpush1.bf16.msra.mxu0 %v1520_v49 }
  0xbe   :  { %820 = vmatprep.subr.bf16.mxu0 %v1528_v50  ;;  %p1671_p8 = pnand %p1670_p7, %p1664_p4 }
  0xc1   :  { %821 = vmatpush1.bf16.msra.mxu0 %v1526_v51 }
  0xc2   :  { %822 = vmatprep.subr.bf16.mxu0 %v1534_v52 }
  0xc5   :  { %823 = vmatpush1.bf16.msra.mxu0 %v1532_v53 }
  0xc6   :  { %824 = vmatprep.subr.bf16.mxu0 %v1540_v54 }
  0xc9   :  { %825 = vmatpush1.bf16.msra.mxu0 %v1538_v55 }
  0xca   :  { %837 = vmatprep.subr.bf16.mxu0 %v1546_v58  ;;  %v1314_v58 = vld [vmem:[%s1828_s6] ss:$0 sm:$0xff] }
  0xcc   :  { %827 = vmatmul.mubr.bf16.vlgmr.msra.gmra.mrb[0].mxu0 %v101_v59 }
  0xcd   :  { %838 = vmatpush1.bf16.msra.mxu0 %v1544_v60  ;;  %869 = vmatprep.mubr.bf16.mxu0 %v1703_v61 }
  0xd8   :  { %1296 = vmatmul.mubr.msk.bf16.vlgmr.msra.gmra.mrb[0].mxu0 %vm704_vm0, %v103_v0 }
 0x165   :  { %v742_v9 = vpop.f32.mrb[0].mxu1 }
 0x166   :  { %v744_v10 = vpop.f32.mrb[1].mxu1  ;;  %v743_v20 = vadd.f32 %v742_v9, %v207_v18 }
 0x167   :  { %v746_v11 = vpop.f32.mrb[2].mxu1  ;;  %v745_v21 = vadd.f32 %v744_v10, %v211_v19 }
 0x168   :  { %v748_v12 = vpop.f32.mrb[3].mxu1  ;;  %v747_v23 = vadd.f32 %v746_v11, %v207_v18 }
 0x169   :  { %v749_v26 = vadd.f32 %v748_v12, %v211_v19 }
 0x1ab   :  { %v871_v22 = vpop.f32.mrb[0].mxu0 }
 0x1ac   :  { %v1375_v24 = vadd.f32 %v871_v22, %v743_v20  ;;  %v873_v25 = vpop.f32.mrb[1].mxu0 }
 0x1ad   :  { %v1377_v27 = vadd.f32 %v873_v25, %v745_v21  ;;  %v875_v28 = vpop.f32.mrb[2].mxu0 }
 0x1ae   :  { %v1379_v29 = vadd.f32 %v875_v28, %v747_v23  ;;  %v877_v30 = vpop.f32.mrb[3].mxu0  ;;  %v880_v32 = vmax.f32 %v1375_v24, 0.0 }
 0x1af   :  { %v1381_v31 = vadd.f32 %v877_v30, %v749_v26  ;;  %v881_v34 = vmax.f32 %v1377_v27, 0.0 }
 0x1b0   :  { %v882_v33 = vmax.f32 %v1379_v29, 0.0 }
 0x1b1   :  { %v883_v35 = vmax.f32 %v1381_v31, 0.0 }
 0x1b2   :  { %v884_v36 = vpack.c.bf16 %v882_v33, %v880_v32 }
 0x1b3   :  { %v885_v37 = vpack.c.bf16 %v883_v35, %v881_v34 }
 0x1b5   :  { %1053 = vmatprep.mubr.bf16.mxu1 %v885_v37 }
 0x1b6   :  { %1054 = vmatmul.mubr.bf16.vlgmr.msra.gmra.mrb[4].mxu1 %v884_v36 }
 0x1b7   :  { %1355 = vmatpush3.bf16.msra.mxu1 %v1567_v38  ;;  %1370 = vmatprep.mubr.msk.bf16.mxu1 %vm1705_vm1, %v1704_v8 }
 0x1b8   :  { %1356 = vmatprep.subr.bf16.mxu1 %v1704_v8 }
 0x1bb   :  { %1357 = vmatpush3.bf16.msra.mxu1 %v1568_v39 }
 0x1bc   :  { %1358 = vmatprep.subr.bf16.mxu1 %v1704_v8 }
 0x1bf   :  { %1359 = vmatpush3.bf16.msra.mxu1 %v1569_v40 }
 0x1c0   :  { %1360 = vmatprep.subr.bf16.mxu1 %v1704_v8 }
 0x1c3   :  { %1361 = vmatpush3.bf16.msra.mxu1 %v1570_v41 }
 0x1c4   :  { %1362 = vmatprep.subr.bf16.mxu1 %v1704_v8 }
 0x1c7   :  { %1363 = vmatpush3.bf16.msra.mxu1 %v1571_v42 }
 0x1c8   :  { %1364 = vmatprep.subr.bf16.mxu1 %v1704_v8 }
 0x1cb   :  { %1365 = vmatpush3.bf16.msra.mxu1 %v1572_v43 }
 0x1cc   :  { %1366 = vmatprep.subr.bf16.mxu1 %v1704_v8 }
 0x1cf   :  { %1367 = vmatpush3.bf16.msra.mxu1 %v1573_v44 }
 0x1d0   :  { %1368 = vmatprep.subr.bf16.mxu1 %v1704_v8 }
 0x1d3   :  { %1369 = vmatpush3.bf16.msra.mxu1 %v1574_v45 }
 0x289   :  { %v1339_v46 = vpop.f32.mrb[4].mxu1 }
 0x28a   :  { %v1340_v48 = vpop.f32.mrb[5].mxu1 }
 0x28b   :  { %v1341_v49 = vadd.f32 %v1340_v48, %v1339_v46  ;;  %v1342_v50 = vpop.f32.mrb[6].mxu1 }
 0x28c   :  { %v1343_v51 = vpop.f32.mrb[7].mxu1 }
 0x28d   :  { %v1056_v52 = vadd.f32 %v1341_v49, %v1297_v47  ;;  %v1344_v53 = vadd.f32 %v1343_v51, %v1342_v50 }
 0x28f   :  { %v1059_v54 = vadd.f32 %v1344_v53, %v1297_v47  ;;  %v1062_v55 = vmax.f32 %v1056_v52, 0.0 }
 0x291   :  { %v1063_v56 = vmax.f32 %v1059_v54, 0.0 }
 0x293   :  { %v1064_v57 = vpack.c.bf16 %v1063_v56, %v1062_v55 }
 0x295   :  { %1371 = vmatmul.mubr.bf16.vlgmr.msra.gmra.mrb[8].mxu1 %v1064_v57 }
 0x368   :  { %v1170_v59 = vpop.f32.mrb[8].mxu1 }
 0x369   :  { %v1171_v60 = vadd.f32 %v1314_v58, %v1170_v59  ;;  %v1372_v61 = vpop.f32.mrb[9].mxu1 }
 0x36a   :  { %v1173_v62 = vpop.f32.mrb[10].mxu1 }
 0x36b   :  { %1177 = vst [vmem:[#allocation10] sm:$0xff] %v1171_v60  ;;  %v1174_v63 = vadd.f32 %v1314_v58, %v1173_v62  ;;  %v1373_v0 = vpop.f32.mrb[11].mxu1 }
 0x36d   :  { %1178 = vst [vmem:[#allocation10 + $0x8] sm:$0xff] %v1174_v63 }
 0x36e   :  { %1674 = shalt.err (!%p1671_p8)
}
 0x36f   :  { %s1675_s17 = scalar_lea.hbm %s1829_s7, 256 }
 0x370   :  { %p1676_p9 = scmp.ne.s32.totalorder %s1829_s7, %s1675_s17  ;;  %p1679_p10 = scmp.lt.u32.totalorder %s1675_s17, %s1829_s7 }
 0x372   :  { %p1681_p11 = pnand %p1679_p10, %p1676_p9 }
 0x374   :  { %1684 = shalt.err (!%p1681_p11)
}
 0x375   :  { %1190 = dma.vmem_to_hbm [thread:$0]  %s1185_s14, 256, %s1829_s7, [#allocation4], %s1694_s11, %s1694_s11, %s1695_s12  }
 0x376   :  { %1691 = dma.done.wait [#allocation4], 256  }
 0x377   :  { %1692 = vsyncadd [#allocation4], 4294967040 }
 0x378   :  { %1194 = vsyncpa [#allocation3], 1 }
 0x379   :  { %1195 = vsyncpa [#allocation6], 1 }
 0x37a   :  { %1196 = vsyncpa [#allocation9], 1 }
 0x37b   :  { %1197 = vsyncpa [#allocation4], 1 }

</bundles_post_ra>
